<compile_context>
chip_gen: v5e
topology: v5e:2x2
jax: 0.10.0
libtpu: 0.0.40
codegen_flags: <defaults>
</compile_context>

<pallas_src>
import math

import numpy as np

import jax
import jax.numpy as jnp
from jax import lax
from jax.experimental import pallas as pl
from jax.experimental.pallas import tpu as pltpu


_VMEM_BUDGET = 14 * 1024 * 1024  # stay under every generation's default scoped VMEM


def _round_up(a, b):
    return -(-a // b) * b


# --------------------------------------------------------------------------
# DCT basis (identical to the PyTorch module's generate_dct_matrix)
# --------------------------------------------------------------------------
def generate_dct_matrix(ps=8):
    def build_filter(pos, freq, POS):
        result = math.cos(math.pi * freq * (pos + 0.5) / POS) / math.sqrt(POS)
        if freq == 0:
            return result
        return result * math.sqrt(2)

    m = np.zeros((ps, ps, ps, ps), dtype=np.float64)
    for u in range(ps):
        for v in range(ps):
            for i in range(ps):
                for j in range(ps):
                    m[u, v, i, j] = build_filter(i, u, ps) * build_filter(j, v, ps)
    # (ps*ps, ps, ps) with k = u*ps + v  (same flattening as the PyTorch code)
    return m.reshape(-1, ps, ps).astype(np.float32)


# --------------------------------------------------------------------------
# Fused path: DCT basis folded together with the patch/channel scatter
# --------------------------------------------------------------------------
def _build_fused_weight(dct_basis, ps, W):
    """(3, ps*W, Wp*3*ps*ps):  weight[g, i*W + wp*ps + j, wp*3N + g*N + u*ps+v]
    = DCT2D[u*ps+v, i, j];  zero elsewhere (block-diag over wp, one-hot over g)."""
    N = ps * ps
    Wp = W // ps
    base_t = np.asarray(dct_basis, np.float32).reshape(N, N).T.reshape(ps, ps, N)
    eye_wp = np.eye(Wp, dtype=np.float32)
    # blk[i, wp_in, j, wp_out, k] = delta(wp_in, wp_out) * DCT2D[k, i*ps+j]
    blk = np.einsum('pq,ijk->ipjqk', eye_wp, base_t)
    w = np.zeros((3, ps, Wp, ps, Wp, 3, N), dtype=np.float32)
    for g in range(3):
        w[g, :, :, :, :, g, :] = blk
    return w.reshape(3, ps * W, Wp * 3 * N)


def _dct_fused_kernel(x_ref, w_ref, o_ref):
    # x_ref: (1, 3, R, ps*W)  band of patch-rows in the free (B,3,Hp,ps*W) view
    # w_ref: (3, ps*W, Wp*3*ps*ps)  resident fused DCT+scatter weight
    # o_ref: (1, R, Wp*3*ps*ps)     lane-dense output slab
    xb = x_ref[0]                                   # (3, R, ps*W)
    acc = jnp.dot(xb[0], w_ref[0],
                  preferred_element_type=jnp.float32,
                  precision=lax.Precision.HIGHEST)
    for g in (1, 2):                                # 3 color groups, accumulate on MXU
        acc = acc + jnp.dot(xb[g], w_ref[g],
                            preferred_element_type=jnp.float32,
                            precision=lax.Precision.HIGHEST)
    o_ref[0] = acc.astype(o_ref.dtype)


def _fused_plan(ps, H, W):
    """Pick the patch-row band R and decide whether the fused path fits VMEM."""
    Hp = H // ps
    N = ps * ps
    Wp = W // ps
    w_bytes = 3 * (ps * W) * (Wp * 3 * N) * 4
    row_bytes = 4 * (3 * ps * W * 4)     # 2x double-buffered (in + out) per patch-row
    R = Hp
    if Hp % 8 == 0:                      # block 2nd-to-last dim must be %8 or full
        while R % 16 == 0 and w_bytes + R * row_bytes > _VMEM_BUDGET:
            R //= 2
    ok = (w_bytes + R * row_bytes) <= _VMEM_BUDGET
    return R, ok


def _encoder_dct_fused(x, dct_basis, ps):
    B, C, H, W = x.shape
    Hp, Wp, N = H // ps, W // ps, ps * ps
    Cout = 3 * N
    lane_in = ps * W            # merged (i, wp, j) lane dim of one patch-row
    lane_out = Wp * Cout        # merged (wp, g, u, v) lane dim of one output row

    w_fused = jnp.asarray(_build_fused_weight(dct_basis, ps, W))
    x4 = x.reshape(B, 3, Hp, lane_in)                    # free contiguous view

    R, _ = _fused_plan(ps, H, W)
    grid = (B, Hp // R)

    out = pl.pallas_call(
        _dct_fused_kernel,
        out_shape=jax.ShapeDtypeStruct((B, Hp, lane_out), jnp.float32),
        grid=grid,
        in_specs=[
            pl.BlockSpec((1, 3, R, lane_in), lambda b, r: (b, 0, r, 0)),
            pl.BlockSpec((3, lane_in, lane_out), lambda b, r: (0, 0, 0)),  # resident
        ],
        out_specs=pl.BlockSpec((1, R, lane_out), lambda b, r: (b, r, 0)),
        compiler_params=pltpu.CompilerParams(
            dimension_semantics=("parallel", "parallel")),
    )(x4, w_fused)

    return out.reshape(B, Hp * Wp, Cout)                 # free contiguous view


# --------------------------------------------------------------------------
# Fallback path: wrapper im2col + lane-dense 128-wide block-diagonal matmul
# --------------------------------------------------------------------------
def _dct_packed_kernel(p_ref, w_ref, o_ref):
    # p_ref: (TM, g*K) packed patches, w_ref: (g*K, g*N) block-diag DCT^T
    o_ref[...] = jnp.dot(p_ref[...], w_ref[...],
                         preferred_element_type=jnp.float32,
                         precision=lax.Precision.HIGHEST).astype(o_ref.dtype)


def _encoder_dct_packed(x, dct_basis, ps):
    B, C, H, W = x.shape
    Hp, Wp = H // ps, W // ps
    K = N = ps * ps
    M = B * Hp * Wp * 3

    # im2col: (B,3,H,W) -> (B,Hp,Wp,3,ps,ps) -> (M, K)
    # TODO(synk): this 6-D transpose is materialized by XLA as one extra HBM pass;
    # it is only taken when the fused kernel's scatter weight would not fit VMEM.
    patches = x.reshape(B, 3, Hp, ps, Wp, ps).transpose(0, 2, 4, 1, 3, 5).reshape(M, K)

    # Lane-dense packing: g_pack patches per 128-wide row, block-diagonal weight.
    g_pack = 128 // K if (K <= 128 and 128 % K == 0) else 1
    while g_pack > 1 and M % g_pack:
        g_pack //= 2
    Mrows, Kp = M // g_pack, g_pack * K
    w_t = np.asarray(dct_basis, np.float32).reshape(N, K).T             # (K, N)
    w_bd = jnp.asarray(np.kron(np.eye(g_pack, dtype=np.float32), w_t))  # (Kp, Kp)
    packed = patches.reshape(Mrows, Kp)                                 # free reshape

    # Large row tile (>=2 grid steps for megacore); capped so 2x(in+out) tiles fit
    # v5e's 16 MiB default scoped VMEM without raising vmem_limit_bytes.
    if Mrows <= 8:
        TM = Mrows
    else:
        TM = min(4096, _round_up(pl.cdiv(Mrows, 2), 8))
    grid = (pl.cdiv(Mrows, TM),)
    # No jnp.pad / no output slice: Pallas clamps the partial last block; the stale
    # rows of that input buffer only feed output rows that are never written back.

    out = pl.pallas_call(
        _dct_packed_kernel,
        out_shape=jax.ShapeDtypeStruct((Mrows, Kp), jnp.float32),
        grid=grid,
        in_specs=[
            pl.BlockSpec((TM, Kp), lambda i: (i, 0)),
            pl.BlockSpec((Kp, Kp), lambda i: (0, 0)),      # resident DCT weight
        ],
        out_specs=pl.BlockSpec((TM, Kp), lambda i: (i, 0)),
        compiler_params=pltpu.CompilerParams(dimension_semantics=("parallel",)),
    )(packed, w_bd)

    return out.reshape(B, Hp * Wp, 3 * N)                  # free contiguous view


# --------------------------------------------------------------------------
# Public wrapper
# --------------------------------------------------------------------------
def encoder_dct_pallas(x, dct_basis, ps, force_path=None):
    """x: (B, 3, H, W) float32, dct_basis: (ps*ps, ps, ps) float32."""
    B, C, H, W = x.shape
    assert C == 3 and H % ps == 0 and W % ps == 0, (x.shape, ps)
    if force_path is None:
        _, fused_ok = _fused_plan(ps, H, W)
        path = "fused" if fused_ok else "packed"
    else:
        path = force_path
    if path == "fused":
        return _encoder_dct_fused(x, dct_basis, ps)
    return _encoder_dct_packed(x, dct_basis, ps)


# --------------------------------------------------------------------------
# Pure-JAX reference mirroring the PyTorch forward (grouped conv + rearrange)
# --------------------------------------------------------------------------
def encoder_dct_ref(x, dct_basis, ps):
    conv_w = jnp.concatenate([dct_basis[:, None]] * 3, axis=0)   # (3*ps*ps,1,ps,ps)
    out = lax.conv_general_dilated(
        x, conv_w,
        window_strides=(ps, ps), padding="VALID",
        dimension_numbers=("NCHW", "OIHW", "NCHW"),
        feature_group_count=3,
        precision=lax.Precision.HIGHEST)
    B, C, Hp, Wp = out.shape
    return out.reshape(B, C, Hp * Wp).transpose(0, 2, 1)          # b (h w) c


if __name__ == "__main__":
    ps = 4
    dct_basis = jnp.asarray(generate_dct_matrix(ps))              # (ps*ps, ps, ps)
    key = jax.random.PRNGKey(0)

    cases = [
        ((2, 3, 16, 16), None),      # primary fused path (no transpose / pad / slice)
        ((2, 3, 32, 32), "fused"),   # fused path with an 8-patch-row band
        ((2, 3, 16, 16), "packed"),  # lane-dense block-diagonal fallback path
    ]

    for idx, (shape, force) in enumerate(cases):
        key, sub = jax.random.split(key)
        x = jax.random.normal(sub, shape, jnp.float32)
        fwd = jax.jit(lambda x_, f=force: encoder_dct_pallas(x_, dct_basis, ps,
                                                             force_path=f))
        out = jax.block_until_ready(fwd(x))
        ref = encoder_dct_ref(x, dct_basis, ps)
        B, _, H, W = shape
        assert out.shape == (B, (H // ps) * (W // ps), 3 * ps * ps), out.shape
        max_err = float(jnp.max(jnp.abs(out - ref)))
        assert max_err < 1e-4, f"case {idx} ({shape}, {force}): max abs err = {max_err}"

    print("KERNEL_OK")
</pallas_src>

<mosaic_0001>
module attributes {stable_mosaic.version = 11 : i64} {
  func.func @_dct_fused_kernel(%arg0: i32, %arg1: i32, %arg2: memref<1x3x4x64xf32, #tpu.memory_space<vmem>>, %arg3: memref<3x64x192xf32, #tpu.memory_space<vmem>>, %arg4: memref<1x4x192xf32, #tpu.memory_space<vmem>>) attributes {dimension_semantics = [#tpu.dimension_semantics<parallel>, #tpu.dimension_semantics<parallel>], iteration_bounds = array<i64: 2, 1>, scalar_prefetch = 0 : i64, scratch_operands = 0 : i64, tpu.core_type = #tpu.core_type<tc>, window_params = [{transform_indices = @transform_0, window_bounds = array<i64: 1, 3, 4, 64>}, {pipeline_mode = #tpu.pipeline_mode<synchronous>, transform_indices = @transform_1, window_bounds = array<i64: 3, 64, 192>}, {transform_indices = @transform_2, window_bounds = array<i64: 1, 4, 192>}]} {
    %c0 = arith.constant 0 : index
    %c0_0 = arith.constant 0 : index
    %c0_1 = arith.constant 0 : index
    %c0_2 = arith.constant 0 : index
    %0 = vector.load %arg2[%c0, %c0_0, %c0_1, %c0_2] : memref<1x3x4x64xf32, #tpu.memory_space<vmem>>, vector<1x3x4x64xf32>
    %1 = vector.shape_cast %0 : vector<1x3x4x64xf32> to vector<3x4x64xf32>
    %2 = vector.extract_strided_slice %1 {offsets = [0, 0, 0], sizes = [1, 4, 64], strides = [1, 1, 1]} : vector<3x4x64xf32> to vector<1x4x64xf32>
    %3 = vector.shape_cast %2 : vector<1x4x64xf32> to vector<4x64xf32>
    %c0_3 = arith.constant 0 : index
    %c0_4 = arith.constant 0 : index
    %c0_5 = arith.constant 0 : index
    %4 = vector.load %arg3[%c0_3, %c0_4, %c0_5] : memref<3x64x192xf32, #tpu.memory_space<vmem>>, vector<1x64x192xf32>
    %5 = vector.shape_cast %4 : vector<1x64x192xf32> to vector<64x192xf32>
    %cst = arith.constant dense<0.000000e+00> : vector<4x192xf32>
    %6 = tpu.matmul %3, %5, %cst {dimension_numbers = #tpu.dot_dimension_numbers<[1], [0], [0], [1], [0, 0, 1, 1], [], []>, precision = #tpu.contract_precision<fp32>} : vector<4x64xf32>, vector<64x192xf32>, vector<4x192xf32> -> vector<4x192xf32>
    %7 = vector.extract_strided_slice %1 {offsets = [1, 0, 0], sizes = [1, 4, 64], strides = [1, 1, 1]} : vector<3x4x64xf32> to vector<1x4x64xf32>
    %8 = vector.shape_cast %7 : vector<1x4x64xf32> to vector<4x64xf32>
    %c1 = arith.constant 1 : index
    %c0_6 = arith.constant 0 : index
    %c0_7 = arith.constant 0 : index
    %9 = vector.load %arg3[%c1, %c0_6, %c0_7] : memref<3x64x192xf32, #tpu.memory_space<vmem>>, vector<1x64x192xf32>
    %10 = vector.shape_cast %9 : vector<1x64x192xf32> to vector<64x192xf32>
    %cst_8 = arith.constant dense<0.000000e+00> : vector<4x192xf32>
    %11 = tpu.matmul %8, %10, %cst_8 {dimension_numbers = #tpu.dot_dimension_numbers<[1], [0], [0], [1], [0, 0, 1, 1], [], []>, precision = #tpu.contract_precision<fp32>} : vector<4x64xf32>, vector<64x192xf32>, vector<4x192xf32> -> vector<4x192xf32>
    %12 = arith.addf %6, %11 : vector<4x192xf32>
    %13 = vector.extract_strided_slice %1 {offsets = [2, 0, 0], sizes = [1, 4, 64], strides = [1, 1, 1]} : vector<3x4x64xf32> to vector<1x4x64xf32>
    %14 = vector.shape_cast %13 : vector<1x4x64xf32> to vector<4x64xf32>
    %c2 = arith.constant 2 : index
    %c0_9 = arith.constant 0 : index
    %c0_10 = arith.constant 0 : index
    %15 = vector.load %arg3[%c2, %c0_9, %c0_10] : memref<3x64x192xf32, #tpu.memory_space<vmem>>, vector<1x64x192xf32>
    %16 = vector.shape_cast %15 : vector<1x64x192xf32> to vector<64x192xf32>
    %cst_11 = arith.constant dense<0.000000e+00> : vector<4x192xf32>
    %17 = tpu.matmul %14, %16, %cst_11 {dimension_numbers = #tpu.dot_dimension_numbers<[1], [0], [0], [1], [0, 0, 1, 1], [], []>, precision = #tpu.contract_precision<fp32>} : vector<4x64xf32>, vector<64x192xf32>, vector<4x192xf32> -> vector<4x192xf32>
    %18 = arith.addf %12, %17 : vector<4x192xf32>
    %c0_12 = arith.constant 0 : index
    %c0_13 = arith.constant 0 : index
    %c0_14 = arith.constant 0 : index
    %19 = vector.load %arg4[%c0_12, %c0_13, %c0_14] : memref<1x4x192xf32, #tpu.memory_space<vmem>>, vector<1x4x192xf32>
    %20 = vector.shape_cast %19 : vector<1x4x192xf32> to vector<4x192xf32>
    %21 = vector.shape_cast %18 : vector<4x192xf32> to vector<1x4x192xf32>
    tpu.vector_store %arg4[%c0_12, %c0_13, %c0_14], %21 {strides = array<i32>} : memref<1x4x192xf32, #tpu.memory_space<vmem>>, vector<1x4x192xf32>,
    return
  }
  func.func @transform_0(%arg0: i32, %arg1: i32) -> (i32, i32, i32, i32) {
    %c0_i32 = arith.constant 0 : i32
    %c0_i32_0 = arith.constant 0 : i32
    %c0_i32_1 = arith.constant 0 : i32
    return %arg0, %c0_i32, %arg1, %c0_i32_0 : i32, i32, i32, i32
  }
  func.func @transform_1(%arg0: i32, %arg1: i32) -> (i32, i32, i32) {
    %c0_i32 = arith.constant 0 : i32
    %c0_i32_0 = arith.constant 0 : i32
    %c0_i32_1 = arith.constant 0 : i32
    %c0_i32_2 = arith.constant 0 : i32
    return %c0_i32, %c0_i32_0, %c0_i32_1 : i32, i32, i32
  }
  func.func @transform_2(%arg0: i32, %arg1: i32) -> (i32, i32, i32) {
    %c0_i32 = arith.constant 0 : i32
    %c0_i32_0 = arith.constant 0 : i32
    return %arg0, %arg1, %c0_i32 : i32, i32, i32
  }
}

</mosaic_0001>

<bundles_post_ra>
// kernel: _lambda_.1
= control target key start
LH: loop header
LB: loop body
LE: loop exit
PB: predicated region body
PF: predicated region fallthrough
CT: control target
= control target key end

     0   :  { %7 = vsyncpa [#allocation3], 0  ;;  %s1919_s9 = smov 0   ;;  %s1921_s10 = smov 0   ;;  %s2758_s0 = inlined_call_operand.vmem [shape: f32[2,3,4,64], index: 0, kind: input, shape index: {}]   ;;  %s2759_s1 = inlined_call_operand.hbm [shape: f32[3,64,192], index: 1, kind: input, shape index: {}]   ;;  %s2760_s2 = inlined_call_operand.vmem [shape: f32[2,4,192], index: 2, kind: output, shape index: {}]  }
   0x1   :  { %s1923_s11 = smov 0  }
   0x2 LB: > { %s1792_s12 = sadd.s32 4294967295, %s1899_s11   ;;  %s25_s13 = sadd.s32 1, %s1895_s10  ;;  %s1899_s11 = sphi %s1923_s11, %s13_s11   ;;  %s1895_s10 = sphi %s1921_s10, %s2762_s10   ;;  %s1891_s9 = sphi %s1919_s9, %s2761_s9  }
   0x3   : > { %p27_p0 = scmp.ge.s32.totalorder %s25_s13, 2  ;;  %p1794_p1 = scmp.ge.s32.totalorder %s1899_s11, 1 }
   0x4   : > { %p107_p2 = scmp.lt.s32.totalorder %s1899_s11, 3  ;;  %p1814_p4 = scmp.eq.s32.totalorder %s1792_s12, 0 }
   0x5   : > { %s2764_s13 = smov (%p27_p0, %s25_s13), 0  ;;  %s118_s16 = sshll.u32 %s2759_s1, 4  ;;  %s119_s16 = int_to_ptr.hbm [resolvable:$true] %s118_s16 }
   0x6   : > { %p108_p3 = pnand %p1794_p1, %p107_p2  ;;  %s1901_s17 = smov [#allocation2]  }
   0x7   : > { %s120_s18 = sshll.u32 %s1901_s17, 4  ;;  %s1902_s19 = smov 256   ;;  %s121_s18 = int_to_ptr.vmem [resolvable:$true] %s120_s18 }
   0x8   : > { %p1810_p5 = pneg %p108_p3  ;;  %s1903_s20 = smov 16  }
   0x9   : > { %147 = sbr.rel (%p108_p3) target bundleno = 321 (0x141), region = 28 }
   0xa   : > { %p1811_p6 = pnand %p1814_p4, %p1810_p5 }
   0xc   : > { %1813 = dma.hbm_to_vmem [thread:$0]  (!%p1811_p6), %s119_s16, 6144, %s121_s18, [#allocation3], %s1902_s19, %s1902_s19, %s1903_s20  }
   0xe   : > { %1886 = dma.done.wait (%p1814_p4), [#allocation3], 6144  }
   0xf   : > { %1888 = vsyncadd (%p1814_p4), [#allocation3], 4294961152  ;;  %p177_p7 = scmp.lt.s32.totalorder %s1891_s9, 1  ;;  %v228_v0 = vld [vmem:[#allocation2 + $0xf0] sm:$0xff]  ;;  %v226_v1 = vld [vmem:[#allocation2 + $0xe0] sm:$0xff]  ;;  %vm230_vm0 = vcmask 523264  }
  0x10   : > { %v224_v2 = vld [vmem:[#allocation2 + $0xd0] sm:$0xff]  ;;  %v1944_v3 = vand.u32 4294901760, %v228_v0  ;;  %v1946_v4 = vand.u32 4294901760, %v226_v1  ;;  %v222_v6 = vld [vmem:[#allocation2 + $0xc0] sm:$0xff]  ;;  %v229_v18 = vld [vmem:[#allocation2 + $0xf8] sm:$0xff]  ;;  %vm1684_vm1 = vcmask 1043456  }
  0x11   : > { %v1948_v5 = vand.u32 4294901760, %v224_v2  ;;  %v220_v7 = vld [vmem:[#allocation2 + $0xb0] sm:$0xff]  ;;  %v218_v8 = vld [vmem:[#allocation2 + $0xa0] sm:$0xff]  ;;  %v1950_v9 = vand.u32 4294901760, %v222_v6  ;;  %s2766_s9 = smov (!%p177_p7, %s1891_s9), 1  ;;  %v227_v26 = vld [vmem:[#allocation2 + $0xe8] sm:$0xff] }
  0x12   : > { %v1952_v10 = vand.u32 4294901760, %v220_v7  ;;  %v1954_v11 = vand.u32 4294901760, %v218_v8  ;;  %v216_v12 = vld [vmem:[#allocation2 + $0x90] sm:$0xff]  ;;  %v214_v13 = vld [vmem:[#allocation2 + $0x80] sm:$0xff]  ;;  %243 = vmatpush.msra.mxu0 %v1944_v3  ;;  %v1963_v14 = vsub.f32 %v228_v0, %v1944_v3  ;;  %v1966_v15 = vsub.f32 %v226_v1, %v1946_v4  ;;  %375 = vmatpush.msra.mxu3 %v1944_v3  ;;  %s1805_s21 = smul.u32 12, %s2766_s9  ;;  %v225_v38 = vld [vmem:[#allocation2 + $0xd8] sm:$0xff] }
  0x13   : > { %v1970_v16 = vsub.f32 %v224_v2, %v1948_v5  ;;  %v1972_v17 = vand.u32 4294901760, %v216_v12  ;;  %v1975_v19 = vsub.f32 %v222_v6, %v1950_v9  ;;  %v1988_v25 = vand.u32 4294901760, %v214_v13  ;;  %v223_v42 = vld [vmem:[#allocation2 + $0xc8] sm:$0xff]  ;;  %v221_v43 = vld [vmem:[#allocation2 + $0xb8] sm:$0xff]  ;;  %s1804_s25 = sshll.u32 %s2766_s9, 3 }
  0x14   : > { %v1978_v20 = vsub.f32 %v220_v7, %v1952_v10  ;;  %v1981_v21 = vsub.f32 %v218_v8, %v1954_v11  ;;  %245 = vmatpush.msra.mxu0 %v1946_v4  ;;  %338 = vmatpush.msra.mxu2 %v1963_v14  ;;  %v277_v22 = vand.u32 4294901760, %v1963_v14  ;;  %v283_v23 = vand.u32 4294901760, %v1966_v15  ;;  %v219_v46 = vld [vmem:[#allocation2 + $0xa8] sm:$0xff]  ;;  %s2031_s24 = scalar_lea.vmem %s2758_s0, %s1805_s21  ;;  %v217_v59 = vld [vmem:[#allocation2 + $0x98] sm:$0xff]  ;;  %s193_s28 = scalar_lea.vmem %s2760_s2, %s1804_s25 }
  0x15   : > { %v289_v24 = vand.u32 4294901760, %v1970_v16  ;;  %377 = vmatpush.msra.mxu3 %v1946_v4  ;;  %v295_v27 = vand.u32 4294901760, %v1975_v19  ;;  %v1993_v28 = vsub.f32 %v216_v12, %v1972_v17  ;;  %v1995_v29 = vand.u32 4294901760, %v229_v18  ;;  %v195_v60 = vld [vmem:[%s2031_s24 + $0x4] sm:$0xf] }
  0x16   : > { %247 = vmatpush.msra.mxu0 %v1948_v5  ;;  %341 = vmatpush.msra.mxu2 %v1966_v15  ;;  %v278_v30 = vsub.f32 %v1963_v14, %v277_v22  ;;  %v284_v31 = vsub.f32 %v1966_v15, %v283_v23  ;;  %v301_v33 = vand.u32 4294901760, %v1978_v20  ;;  %v307_v35 = vand.u32 4294901760, %v1981_v21 }
  0x17   : > { %v290_v32 = vsub.f32 %v1970_v16, %v289_v24  ;;  %379 = vmatpush.msra.mxu3 %v1948_v5  ;;  %v296_v34 = vsub.f32 %v1975_v19, %v295_v27  ;;  %v2015_v36 = vand.u32 4294901760, %v227_v26  ;;  %v2018_v37 = vsub.f32 %v229_v18, %v1995_v29 }
  0x18   : > { %249 = vmatpush.msra.mxu0 %v1950_v9  ;;  %344 = vmatpush.msra.mxu2 %v1970_v16  ;;  %v279_v39 = vand.u32 4294901760, %v278_v30  ;;  %v285_v40 = vand.u32 4294901760, %v284_v31  ;;  %v2023_v41 = vsub.f32 %v214_v13, %v1988_v25  ;;  %v313_v45 = vand.u32 4294901760, %v1993_v28  ;;  %v215_v13 = vld [vmem:[#allocation2 + $0x88] sm:$0xff] }
  0x19   : > { %381 = vmatpush.msra.mxu3 %v1950_v9  ;;  %v514_v44 = vand.u32 4294901760, %v2018_v37  ;;  %v291_v47 = vand.u32 4294901760, %v290_v32  ;;  %v302_v48 = vsub.f32 %v1978_v20, %v301_v33  ;;  %v2037_v49 = vand.u32 4294901760, %v225_v38 }
  0x1a   : > { %251 = vmatpush.msra.mxu0 %v1952_v10  ;;  %280 = vmatpush.msra.mxu1 %v279_v39  ;;  %v2040_v50 = vsub.f32 %v227_v26, %v2015_v36  ;;  %v297_v51 = vand.u32 4294901760, %v296_v34  ;;  %v308_v52 = vsub.f32 %v1981_v21, %v307_v35  ;;  %v2047_v53 = vand.u32 4294901760, %v223_v42 }
  0x1b   : > { %347 = vmatpush.msra.mxu2 %v1975_v19  ;;  %383 = vmatpush.msra.mxu3 %v1952_v10  ;;  %v2049_v54 = vand.u32 4294901760, %v221_v43  ;;  %v319_v56 = vand.u32 4294901760, %v2023_v41  ;;  %v2055_v57 = vsub.f32 %v225_v38, %v2037_v49  ;;  %v2057_v58 = vand.u32 4294901760, %v219_v46 }
  0x1c   : > { %253 = vmatpush.msra.mxu0 %v1954_v11  ;;  %286 = vmatpush.msra.mxu1 %v285_v40  ;;  %v520_v55 = vand.u32 4294901760, %v2040_v50  ;;  %v515_v61 = vsub.f32 %v2018_v37, %v514_v44  ;;  %v314_v62 = vsub.f32 %v1993_v28, %v313_v45  ;;  %v2069_v63 = vsub.f32 %v223_v42, %v2047_v53 }
  0x1d   : > { %350 = vmatpush.msra.mxu2 %v1978_v20  ;;  %385 = vmatpush.msra.mxu3 %v1954_v11  ;;  %v303_v0 = vand.u32 4294901760, %v302_v48  ;;  %v526_v1 = vand.u32 4294901760, %v2055_v57  ;;  %v2074_v2 = vsub.f32 %v221_v43, %v2049_v54  ;;  %v309_v6 = vand.u32 4294901760, %v308_v52 }
  0x1e   : > { %255 = vmatpush.msra.mxu0 %v1972_v17  ;;  %292 = vmatpush.msra.mxu1 %v291_v47  ;;  %v521_v7 = vsub.f32 %v2040_v50, %v520_v55  ;;  %v2081_v8 = vand.u32 4294901760, %v217_v59  ;;  %v232_v12 = vsel %vm230_vm0, %v195_v60, 0  ;;  %v320_v18 = vsub.f32 %v2023_v41, %v319_v56 }
  0x1f   : > { %353 = vmatpush.msra.mxu2 %v1981_v21  ;;  %387 = vmatpush.msra.mxu3 %v1972_v17  ;;  %v532_v26 = vand.u32 4294901760, %v2069_v63  ;;  %v2090_v30 = vsub.f32 %v219_v46, %v2057_v58  ;;  %v2092_v31 = vand.u32 4294901760, %v232_v12  ;;  %v516_v32 = vand.u32 4294901760, %v515_v61 }
  0x20   : > { %257 = vmatpush.msra.mxu0 %v1988_v25  ;;  %298 = vmatpush.msra.mxu1 %v297_v51  ;;  %v315_v34 = vand.u32 4294901760, %v314_v62  ;;  %v527_v38 = vsub.f32 %v2055_v57, %v526_v1  ;;  %v538_v39 = vand.u32 4294901760, %v2074_v2  ;;  %v2105_v42 = vand.u32 4294901760, %v215_v13 }
  0x21   : > { %356 = vmatpush.msra.mxu2 %v1993_v28  ;;  %389 = vmatpush.msra.mxu3 %v1988_v25  ;;  %v2103_v40 = vsub.f32 %v232_v12, %v2092_v31  ;;  %v522_v14 = vand.u32 4294901760, %v521_v7  ;;  %v321_v43 = vand.u32 4294901760, %v320_v18  ;;  %v533_v46 = vsub.f32 %v2069_v63, %v532_v26  ;;  %v207_v28 = vld [vmem:[#allocation2 + $0x50] sm:$0xff]  ;;  %v210_v7 = vld [vmem:[#allocation2 + $0x68] sm:$0xff]  ;;  %v197_v12 = vld [vmem:[#allocation2] sm:$0xff] }
  0x22   : > { %408 = vmatpush.msrb.mxu0 %v277_v22  ;;  %304 = vmatpush.msra.mxu1 %v303_v0  ;;  %v2111_v22 = vsub.f32 %v217_v59, %v2081_v8  ;;  %v544_v47 = vand.u32 4294901760, %v2090_v30  ;;  %v528_v48 = vand.u32 4294901760, %v527_v38  ;;  %v539_v51 = vsub.f32 %v2074_v2, %v538_v39 }
  0x23   : > { %359 = vmatpush.msra.mxu2 %v2023_v41  ;;  %517 = vmatpush.msrb.mxu3 %v516_v32  ;;  %v2121_v15 = vand.u32 4294901760, %v2103_v40  ;;  %vm1687_vm2 = vcmask 523268  }
  0x24   : > { %412 = vmatpush.msrb.mxu0 %v283_v23  ;;  %310 = vmatpush.msra.mxu1 %v309_v6  ;;  %v2124_v23 = vsub.f32 %v215_v13, %v2105_v42  ;;  %v550_v16 = vand.u32 4294901760, %v2111_v22  ;;  %v545_v52 = vsub.f32 %v2090_v30, %v544_v47  ;;  %v540_v59 = vand.u32 4294901760, %v539_v51  ;;  %vm1688_vm3 = vmor %vm1687_vm2, %vm1684_vm1 }
  0x25   : > { %480 = vmatpush.msrb.mxu2 %v1995_v29  ;;  %523 = vmatpush.msrb.mxu3 %v522_v14  ;;  %v261_v19 = vsub.f32 %v2103_v40, %v2121_v15 }
  0x26   : > { %416 = vmatpush.msrb.mxu0 %v289_v24  ;;  %316 = vmatpush.msra.mxu1 %v315_v34  ;;  %v534_v24 = vand.u32 4294901760, %v533_v46  ;;  %v551_v20 = vsub.f32 %v2111_v22, %v550_v16 }
  0x27   : > { %482 = vmatpush.msrb.mxu2 %v2015_v36  ;;  %529 = vmatpush.msrb.mxu3 %v528_v48 }
  0x28   : > { %420 = vmatpush.msrb.mxu0 %v295_v27  ;;  %322 = vmatpush.msra.mxu1 %v321_v43  ;;  %v556_v27 = vand.u32 4294901760, %v2124_v23 }
  0x29   : > { %484 = vmatpush.msrb.mxu2 %v2037_v49  ;;  %535 = vmatpush.msrb.mxu3 %v534_v24 }
  0x2a   : > { %424 = vmatpush.msrb.mxu0 %v301_v33  ;;  %451 = vmatpush.msrb.mxu1 %v1944_v3  ;;  %v546_v3 = vand.u32 4294901760, %v545_v52  ;;  %v2154_v33 = vand.u32 4294901760, %v261_v19  ;;  %v557_v21 = vsub.f32 %v2124_v23, %v556_v27  ;;  %v204_v52 = vld [vmem:[#allocation2 + $0x38] sm:$0xff] }
  0x2b   : > { %486 = vmatpush.msrb.mxu2 %v2047_v53  ;;  %541 = vmatpush.msrb.mxu3 %v540_v59 }
  0x2c   : > { %428 = vmatpush.msrb.mxu0 %v307_v35  ;;  %453 = vmatpush.msrb.mxu1 %v1946_v4  ;;  %v552_v4 = vand.u32 4294901760, %v551_v20  ;;  %v194_v35 = vld [vmem:[%s2031_s24] sm:$0xf] }
  0x2d   : > { %488 = vmatpush.msrb.mxu2 %v2049_v54  ;;  %547 = vmatpush.msrb.mxu3 %v546_v3  ;;  %v709_v41 = vsel %vm230_vm0, %v194_v35, 0 }
  0x2e   : > { %432 = vmatpush.msrb.mxu0 %v313_v45  ;;  %455 = vmatpush.msrb.mxu1 %v1948_v5  ;;  %v558_v5 = vand.u32 4294901760, %v557_v21 }
  0x2f   : > { %490 = vmatpush.msrb.mxu2 %v2057_v58  ;;  %263 = vmatmul.f32.vlgmr.msra.gmra.mxu0 %v2154_v33 }
  0x30   : > { %436 = vmatpush.msrb.mxu0 %v319_v56  ;;  %457 = vmatpush.msrb.mxu1 %v1950_v9  ;;  %v211_v9 = vld [vmem:[#allocation2 + $0x70] sm:$0xff] }
  0x31   : > { %492 = vmatpush.msrb.mxu2 %v2081_v8  ;;  %553 = vmatpush.msrb.mxu3 %v552_v4 }
  0x32   : > { %459 = vmatpush.msrb.mxu1 %v1952_v10  ;;  %575 = vmatpush.msra.mxu0 %v2018_v37  ;;  %v209_v10 = vld [vmem:[#allocation2 + $0x60] sm:$0xff]  ;;  %v2205_v37 = vand.u32 4294901760, %v207_v28 }
  0x33   : > { %494 = vmatpush.msrb.mxu2 %v2105_v42  ;;  %559 = vmatpush.msrb.mxu3 %v558_v5  ;;  %v2331_v5 = vand.u32 4294901760, %v204_v52 }
  0x34   : > { %362 = vmatmul.f32.vlgmr.msra.gmra.mxu2 %v2103_v40  ;;  %578 = vmatpush.msra.mxu0 %v2040_v50  ;;  %v2221_v50 = vand.u32 4294901760, %v709_v41 }
  0x35   : > { %645 = vmatpush.msra.mxu2 %v514_v44  ;;  %461 = vmatpush.msrb.mxu1 %v1954_v11  ;;  %v2185_v11 = vand.u32 4294901760, %v211_v9  ;;  %v203_v44 = vld [vmem:[#allocation2 + $0x30] sm:$0xff] }
  0x36   : > { %393 = vmatmul.f32.vlgmr.msra.gmra.mxu3 %v2121_v15  ;;  %581 = vmatpush.msra.mxu0 %v2055_v57  ;;  %v2229_v56 = vand.u32 4294901760, %v203_v44  ;;  %v201_v57 = vld [vmem:[#allocation2 + $0x20] sm:$0xff] }
  0x37   : > { %649 = vmatpush.msra.mxu2 %v520_v55  ;;  %688 = vmatpush.msra.mxu3 %v1995_v29  ;;  %v2227_v55 = vsub.f32 %v207_v28, %v2205_v37  ;;  %v2245_v62 = vand.u32 4294901760, %v201_v57 }
  0x38   : > { %463 = vmatpush.msrb.mxu1 %v1972_v17  ;;  %584 = vmatpush.msra.mxu0 %v2069_v63  ;;  %v2192_v17 = vand.u32 4294901760, %v209_v10  ;;  %v212_v63 = vld [vmem:[#allocation2 + $0x78] sm:$0xff]  ;;  %v2250_v0 = vsub.f32 %v203_v44, %v2229_v56 }
  0x39   : > { %324 = vmatmul.f32.vlgmr.msra.gmra.mxu1 %v2092_v31  ;;  %653 = vmatpush.msra.mxu2 %v526_v1  ;;  %v766_v1 = vand.u32 4294901760, %v2227_v55  ;;  %v2266_v18 = vand.u32 4294901760, %v212_v63 }
  0x3a   : > { %690 = vmatpush.msra.mxu3 %v2015_v36  ;;  %465 = vmatpush.msrb.mxu1 %v1988_v25  ;;  %v2201_v25 = vsub.f32 %v211_v9, %v2185_v11  ;;  %v778_v38 = vand.u32 4294901760, %v2250_v0 }
  0x3b   : > { %587 = vmatpush.msra.mxu0 %v2074_v2  ;;  %657 = vmatpush.msra.mxu2 %v532_v26  ;;  %v2254_v2 = vsub.f32 %v709_v41, %v2221_v50  ;;  %v767_v32 = vsub.f32 %v2227_v55, %v766_v1  ;;  %v200_v41 = vld [vmem:[#allocation2 + $0x18] sm:$0xff] }
  0x3c   : > { %612 = vmatpush.msra.mxu1 %v1995_v29  ;;  %692 = vmatpush.msra.mxu3 %v2037_v49  ;;  %v205_v29 = vld [vmem:[#allocation2 + $0x40] sm:$0xff] }
  0x3d   : > { %590 = vmatpush.msra.mxu0 %v2090_v30  ;;  %661 = vmatpush.msra.mxu2 %v538_v39  ;;  %v2216_v45 = vand.u32 4294901760, %v205_v29  ;;  %v2271_v30 = vsub.f32 %v201_v57, %v2245_v62  ;;  %v2279_v34 = vand.u32 4294901760, %v2254_v2  ;;  %v2282_v39 = vand.u32 4294901760, %v210_v7 }
  0x3e   : > { %614 = vmatpush.msra.mxu1 %v2015_v36  ;;  %694 = vmatpush.msra.mxu3 %v2047_v53  ;;  %v2212_v36 = vsub.f32 %v209_v10, %v2192_v17 }
  0x3f   : > { %438 = vmatmul.f32.vlgmr.msrb.gmra.mxu0 %v2092_v31  ;;  %665 = vmatpush.msra.mxu2 %v544_v47  ;;  %v2238_v60 = vsub.f32 %v205_v29, %v2216_v45  ;;  %v2297_v47 = vsub.f32 %v212_v63, %v2266_v18  ;;  %v738_v51 = vsub.f32 %v2254_v2, %v2279_v34  ;;  %v198_v63 = vld [vmem:[#allocation2 + $0x8] sm:$0xff] }
  0x40   : > { %616 = vmatpush.msra.mxu1 %v2037_v49  ;;  %593 = vmatpush.msra.mxu0 %v2111_v22  ;;  %v754_v49 = vand.u32 4294901760, %v2201_v25  ;;  %v2286_v22 = vand.u32 4294901760, %v197_v12  ;;  %v2311_v24 = vsub.f32 %v210_v7, %v2282_v39  ;;  %v2362_v7 = vand.u32 4294901760, %v200_v41 }
  0x41   : > { %696 = vmatpush.msra.mxu3 %v2049_v54  ;;  %467 = vmatmul.f32.vlgmr.msrb.gmra.mxu1 %v2092_v31  ;;  %v772_v13 = vand.u32 4294901760, %v2238_v60  ;;  %v991_v20 = vand.u32 4294901760, %v2297_v47  ;;  %v2334_v9 = vand.u32 4294901760, %v738_v51 }
  0x42   : > { %596 = vmatpush.msra.mxu0 %v2124_v23  ;;  %618 = vmatpush.msra.mxu1 %v2047_v53  ;;  %v760_v53 = vand.u32 4294901760, %v2212_v36  ;;  %v755_v61 = vsub.f32 %v2201_v25, %v754_v49  ;;  %v206_v23 = vld [vmem:[#allocation2 + $0x48] sm:$0xff]  ;;  %v2315_v19 = vsub.f32 %v197_v12, %v2286_v22  ;;  %v997_v28 = vand.u32 4294901760, %v2311_v24 }
  0x43   : > { %669 = vmatpush.msra.mxu2 %v550_v16  ;;  %698 = vmatpush.msra.mxu3 %v2057_v58  ;;  %v773_v43 = vsub.f32 %v2238_v60, %v772_v13  ;;  %v779_v16 = vsub.f32 %v2250_v0, %v778_v38  ;;  %v992_v44 = vsub.f32 %v2297_v47, %v991_v20 }
  0x44   : > { %720 = vmatpush.msrb.mxu0 %v2185_v11  ;;  %620 = vmatpush.msra.mxu1 %v2049_v54  ;;  %v199_v54 = vld [vmem:[#allocation2 + $0x10] sm:$0xff]  ;;  %v761_v6 = vsub.f32 %v2212_v36, %v760_v53  ;;  %v756_v26 = vand.u32 4294901760, %v755_v61 }
  0x45   : > { %673 = vmatpush.msra.mxu2 %v556_v27  ;;  %700 = vmatpush.msra.mxu3 %v2081_v8  ;;  %v2317_v27 = vand.u32 4294901760, %v206_v23  ;;  %v774_v59 = vand.u32 4294901760, %v773_v43  ;;  %v780_v10 = vand.u32 4294901760, %v779_v16  ;;  %v2376_v43 = vand.u32 4294901760, %v198_v63 }
  0x46   : > { %500 = vmatmul.f32.vlgmr.msrb.gmra.mxu2 %v2154_v33  ;;  %722 = vmatpush.msrb.mxu0 %v2192_v17  ;;  %v762_v14 = vand.u32 4294901760, %v761_v6  ;;  %v202_v33 = vld [vmem:[#allocation2 + $0x28] sm:$0xff]  ;;  %v998_v6 = vsub.f32 %v2311_v24, %v997_v28 }
  0x47   : > { %815 = vmatpush.msrb.mxu2 %v2201_v25  ;;  %622 = vmatpush.msra.mxu1 %v2057_v58  ;;  %v2263_v58 = vand.u32 4294901760, %v199_v54  ;;  %v2341_v35 = vsub.f32 %v206_v23, %v2317_v27  ;;  %v2343_v29 = vand.u32 4294901760, %v202_v33  ;;  %v2397_v16 = vsub.f32 %v198_v63, %v2376_v43  ;;  %v196_v63 = vld [vmem:[%s2031_s24 + $0x8] sm:$0xf] }
  0x48   : > { %702 = vmatpush.msra.mxu3 %v2105_v42  ;;  %724 = vmatpush.msrb.mxu0 %v2205_v37  ;;  %v999_v23 = vand.u32 4294901760, %v998_v6 }
  0x49   : > { %561 = vmatmul.f32.vlgmr.msrb.gmra.mxu3 %v2092_v31  ;;  %818 = vmatpush.msrb.mxu2 %v2212_v36  ;;  %v2294_v46 = vsub.f32 %v199_v54, %v2263_v58  ;;  %v2356_v54 = vsub.f32 %v204_v52, %v2331_v5 }
  0x4a   : > { %852 = vmatpush.msrb.mxu3 %v2185_v11  ;;  %624 = vmatpush.msra.mxu1 %v2081_v8  ;;  %v208_v8 = vld [vmem:[#allocation2 + $0x58] sm:$0xff] }
  0x4b   : > { %726 = vmatpush.msrb.mxu0 %v2216_v45  ;;  %821 = vmatpush.msrb.mxu2 %v2227_v55  ;;  %v2301_v48 = vand.u32 4294901760, %v208_v8  ;;  %v790_v3 = vand.u32 4294901760, %v2294_v46 }
  0x4c   : > { %854 = vmatpush.msrb.mxu3 %v2192_v17  ;;  %599 = vmatmul.f32.vlgmr.msra.gmra.mxu0 %v2103_v40  ;;  %v784_v40 = vand.u32 4294901760, %v2271_v30 }
  0x4d   : > { %626 = vmatpush.msra.mxu1 %v2105_v42  ;;  %728 = vmatpush.msrb.mxu0 %v2229_v56  ;;  %v768_v42 = vand.u32 4294901760, %v767_v32  ;;  %v2329_v4 = vsub.f32 %v208_v8, %v2301_v48  ;;  %v791_v57 = vsub.f32 %v2294_v46, %v790_v3  ;;  %v2372_v32 = vsub.f32 %v202_v33, %v2343_v29 }
  0x4e   : > { %824 = vmatpush.msrb.mxu2 %v2238_v60  ;;  %856 = vmatpush.msrb.mxu3 %v2205_v37  ;;  %v785_v21 = vsub.f32 %v2271_v30, %v784_v40  ;;  %v993_v8 = vand.u32 4294901760, %v992_v44 }
  0x4f   : > { %757 = vmatpush.msrb.mxu1 %v756_v26  ;;  %675 = vmatmul.f32.vlgmr.msra.gmra.mxu2 %v2092_v31  ;;  %v1003_v61 = vand.u32 4294901760, %v2329_v4  ;;  %v1009_v26 = vand.u32 4294901760, %v2341_v35  ;;  %v1021_v51 = vand.u32 4294901760, %v2372_v32 }
  0x50   : > { %730 = vmatpush.msrb.mxu0 %v2245_v62  ;;  %827 = vmatpush.msrb.mxu2 %v2250_v0 }
  0x51   : > { %763 = vmatpush.msrb.mxu1 %v762_v14  ;;  %858 = vmatpush.msrb.mxu3 %v2216_v45  ;;  %v792_v14 = vand.u32 4294901760, %v791_v57  ;;  %v1004_v25 = vsub.f32 %v2329_v4, %v1003_v61  ;;  %v1022_v60 = vsub.f32 %v2372_v32, %v1021_v51  ;;  %v1199_v57 = vld [vmem:[#allocation2 + $0x168] sm:$0xff] }
  0x52   : > { %704 = vmatmul.f32.vlgmr.msra.gmra.mxu3 %v2092_v31  ;;  %732 = vmatpush.msrb.mxu0 %v2263_v58  ;;  %v796_v31 = vand.u32 4294901760, %v2315_v19 }
  0x53   : > { %769 = vmatpush.msrb.mxu1 %v768_v42  ;;  %830 = vmatpush.msrb.mxu2 %v2271_v30  ;;  %v2387_v42 = vsub.f32 %v200_v41, %v2362_v7  ;;  %v1005_v55 = vand.u32 4294901760, %v1004_v25 }
  0x54   : > { %860 = vmatpush.msrb.mxu3 %v2229_v56  ;;  %630 = vmatmul.f32.vlgmr.msra.gmra.mxu1 %v2121_v15  ;;  %v786_v15 = vand.u32 4294901760, %v785_v21  ;;  %v797_v12 = vsub.f32 %v2315_v19, %v796_v31 }
  0x55   : > { %734 = vmatpush.msrb.mxu0 %v2286_v22  ;;  %775 = vmatpush.msrb.mxu1 %v774_v59  ;;  %v1027_v52 = vand.u32 4294901760, %v2387_v42 }
  0x56   : > { %833 = vmatpush.msrb.mxu2 %v2294_v46  ;;  %862 = vmatpush.msrb.mxu3 %v2245_v62  ;;  %v798_v36 = vand.u32 4294901760, %v797_v12  ;;  %v1196_v46 = vld [vmem:[#allocation2 + $0x150] sm:$0xff] }
  0x57   : > { %740 = vmatmul.f32.vlgmr.msrb.gmra.mxu0 %v2334_v9  ;;  %781 = vmatpush.msrb.mxu1 %v780_v10  ;;  %v1028_v0 = vsub.f32 %v2387_v42, %v1027_v52  ;;  %v1201_v10 = vld [vmem:[#allocation2 + $0x178] sm:$0xff] }
  0x58   : > { %885 = vmatpush.msra.mxu0 %v754_v49  ;;  %836 = vmatpush.msrb.mxu2 %v2315_v19  ;;  %v1015_v49 = vand.u32 4294901760, %v2356_v54  ;;  %v2521_v44 = vand.u32 4294901760, %v1201_v10 }
  0x59   : > { %864 = vmatpush.msrb.mxu3 %v2263_v58  ;;  %787 = vmatpush.msrb.mxu1 %v786_v15 }
  0x5a   : > { %957 = vmatpush.msra.mxu2 %v2266_v18  ;;  %889 = vmatpush.msra.mxu0 %v760_v53  ;;  %v1010_v53 = vsub.f32 %v2341_v35, %v1009_v26 }
  0x5b   : > { %866 = vmatpush.msrb.mxu3 %v2286_v22  ;;  %839 = vmatmul.f32.vlgmr.msrb.gmra.mxu2 %v2254_v2 }
  0x5c   : > { %893 = vmatpush.msra.mxu0 %v766_v1  ;;  %959 = vmatpush.msra.mxu2 %v2282_v39  ;;  %v1016_v1 = vsub.f32 %v2356_v54, %v1015_v49  ;;  %v1011_v59 = vand.u32 4294901760, %v1010_v53 }
  0x5d   : > { %994 = vmatpush.msra.mxu3 %v993_v8  ;;  %793 = vmatpush.msrb.mxu1 %v792_v14  ;;  %v2550_v14 = vsub.f32 %v1201_v10, %v2521_v44  ;;  %v1187_v10 = vld [vmem:[#allocation2 + $0x108] sm:$0xff] }
  0x5e   : > { %870 = vmatmul.f32.vlgmr.msrb.gmra.mxu3 %v2279_v34  ;;  %897 = vmatpush.msra.mxu0 %v772_v13  ;;  %v1033_v13 = vand.u32 4294901760, %v2397_v16  ;;  %v1017_v33 = vand.u32 4294901760, %v1016_v1  ;;  %v1193_v1 = vld [vmem:[#allocation2 + $0x138] sm:$0xff] }
  0x5f   : > { %961 = vmatpush.msra.mxu2 %v2301_v48  ;;  %1000 = vmatpush.msra.mxu3 %v999_v23  ;;  %v1195_v23 = vld [vmem:[#allocation2 + $0x148] sm:$0xff] }
  0x60   : > { %799 = vmatpush.msrb.mxu1 %v798_v36  ;;  %901 = vmatpush.msra.mxu0 %v778_v38  ;;  %v1023_v38 = vand.u32 4294901760, %v1022_v60 }
  0x61   : > { %801 = vmatmul.f32.vlgmr.msrb.gmra.mxu1 %v2221_v50  ;;  %963 = vmatpush.msra.mxu2 %v2317_v27 }
  0x62   : > { %928 = vmatpush.msra.mxu1 %v2185_v11  ;;  %1006 = vmatpush.msra.mxu3 %v1005_v55  ;;  %v1034_v11 = vsub.f32 %v2397_v16, %v1033_v13 }
  0x63   : > { %905 = vmatpush.msra.mxu0 %v784_v40  ;;  %965 = vmatpush.msra.mxu2 %v2331_v5 }
  0x64   : > { %930 = vmatpush.msra.mxu1 %v2192_v17  ;;  %1012 = vmatpush.msra.mxu3 %v1011_v59  ;;  %v1029_v17 = vand.u32 4294901760, %v1028_v0  ;;  %v1035_v30 = vand.u32 4294901760, %v1034_v11 }
  0x65   : > { %909 = vmatpush.msra.mxu0 %v790_v3  ;;  %967 = vmatpush.msra.mxu2 %v2343_v29 }
  0x66   : > { %932 = vmatpush.msra.mxu1 %v2205_v37  ;;  %1018 = vmatpush.msra.mxu3 %v1017_v33  ;;  %v1200_v37 = vld [vmem:[#allocation2 + $0x170] sm:$0xff]  ;;  %v1191_v33 = vld [vmem:[#allocation2 + $0x128] sm:$0xff] }
  0x67   : > { %913 = vmatpush.msra.mxu0 %v796_v31  ;;  %969 = vmatpush.msra.mxu2 %v2362_v7 }
  0x68   : > { %934 = vmatpush.msra.mxu1 %v2216_v45  ;;  %1024 = vmatpush.msra.mxu3 %v1023_v38  ;;  %v1198_v45 = vld [vmem:[#allocation2 + $0x160] sm:$0xff] }
  0x69   : > { %915 = vmatmul.f32.vlgmr.msra.gmra.mxu0 %v2221_v50  ;;  %971 = vmatpush.msra.mxu2 %v2376_v43 }
  0x6a   : > { %1052 = vmatpush.msrb.mxu0 %v2297_v47  ;;  %936 = vmatpush.msra.mxu1 %v2229_v56  ;;  %v2448_v56 = vand.u32 4294901760, %v1200_v37 }
  0x6b   : > { %1030 = vmatpush.msra.mxu3 %v1029_v17  ;;  %977 = vmatmul.f32.vlgmr.msra.gmra.mxu2 %v2334_v9  ;;  %v2593_v17 = vand.u32 4294901760, %v1193_v1 }
  0x6c   : > { %1055 = vmatpush.msrb.mxu0 %v2311_v24  ;;  %938 = vmatpush.msra.mxu1 %v2245_v62  ;;  %v2455_v62 = vand.u32 4294901760, %v1198_v45  ;;  %v2462_v47 = vsub.f32 %v1200_v37, %v2448_v56  ;;  %v1192_v24 = vld [vmem:[#allocation2 + $0x130] sm:$0xff] }
  0x6d   : > { %1036 = vmatpush.msra.mxu3 %v1035_v30  ;;  %1122 = vmatpush.msrb.mxu2 %v991_v20  ;;  %v2488_v3 = vand.u32 4294901760, %v1192_v24 }
  0x6e   : > { %1038 = vmatmul.f32.vlgmr.msra.gmra.mxu3 %v2221_v50  ;;  %1058 = vmatpush.msrb.mxu0 %v2329_v4  ;;  %v2472_v40 = vsub.f32 %v1198_v45, %v2455_v62  ;;  %v1248_v19 = vand.u32 4294901760, %v2462_v47  ;;  %v1188_v4 = vld [vmem:[#allocation2 + $0x110] sm:$0xff] }
  0x6f   : > { %940 = vmatpush.msra.mxu1 %v2263_v58  ;;  %1126 = vmatpush.msrb.mxu2 %v997_v28  ;;  %v1194_v58 = vld [vmem:[#allocation2 + $0x140] sm:$0xff]  ;;  %v2511_v31 = vsub.f32 %v1192_v24, %v2488_v3 }
  0x70   : > { %1061 = vmatpush.msrb.mxu0 %v2341_v35  ;;  %1165 = vmatpush.msrb.mxu3 %v2266_v18  ;;  %v1186_v28 = vld [vmem:[#allocation2 + $0x100] sm:$0xff]  ;;  %v2513_v35 = vand.u32 4294901760, %v1188_v4 }
  0x71   : > { %942 = vmatpush.msra.mxu1 %v2286_v22  ;;  %1130 = vmatpush.msrb.mxu2 %v1003_v61  ;;  %v2467_v22 = vand.u32 4294901760, %v1196_v46  ;;  %v2528_v61 = vand.u32 4294901760, %v1186_v28  ;;  %v1272_v12 = vand.u32 4294901760, %v2511_v31 }
  0x72   : > { %944 = vmatmul.f32.vlgmr.msra.gmra.mxu1 %v2221_v50  ;;  %1064 = vmatpush.msrb.mxu0 %v2356_v54  ;;  %v1197_v54 = vld [vmem:[#allocation2 + $0x158] sm:$0xff] }
  0x73   : > { %1089 = vmatpush.msrb.mxu1 %v2266_v18  ;;  %1167 = vmatpush.msrb.mxu3 %v2282_v39  ;;  %v2474_v18 = vand.u32 4294901760, %v1194_v58  ;;  %v2486_v20 = vsub.f32 %v1196_v46, %v2467_v22  ;;  %v1189_v46 = vld [vmem:[#allocation2 + $0x118] sm:$0xff] }
  0x74   : > { %1067 = vmatpush.msrb.mxu0 %v2372_v32  ;;  %1134 = vmatpush.msrb.mxu2 %v1009_v26  ;;  %v2540_v26 = vsub.f32 %v1188_v4, %v2513_v35  ;;  %v2542_v32 = vand.u32 4294901760, %v1199_v57  ;;  %v2611_v4 = vand.u32 4294901760, %v1191_v33 }
  0x75   : > { %1091 = vmatpush.msrb.mxu1 %v2282_v39  ;;  %1169 = vmatpush.msrb.mxu3 %v2301_v48  ;;  %v1190_v39 = vld [vmem:[#allocation2 + $0x120] sm:$0xff]  ;;  %v2494_v21 = vsub.f32 %v1194_v58, %v2474_v18 }
  0x76   : > { %1070 = vmatpush.msrb.mxu0 %v2387_v42  ;;  %1138 = vmatpush.msrb.mxu2 %v1015_v49  ;;  %v2499_v9 = vand.u32 4294901760, %v1190_v39  ;;  %v2556_v49 = vsub.f32 %v1186_v28, %v2528_v61  ;;  %v1203_v42 = vsel %vm230_vm0, %v196_v63, 0  ;;  %v1284_v53 = vand.u32 4294901760, %v2540_v26 }
  0x77   : > { %1093 = vmatpush.msrb.mxu1 %v2301_v48  ;;  %1171 = vmatpush.msrb.mxu3 %v2317_v27  ;;  %v1254_v48 = vand.u32 4294901760, %v2472_v40  ;;  %v1266_v41 = vand.u32 4294901760, %v2494_v21  ;;  %v2576_v55 = vand.u32 4294901760, %v1203_v42 }
  0x78   : > { %1073 = vmatpush.msrb.mxu0 %v2397_v16  ;;  %1142 = vmatpush.msrb.mxu2 %v1021_v51  ;;  %v2526_v15 = vsub.f32 %v1190_v39, %v2499_v9  ;;  %v2569_v51 = vsub.f32 %v1199_v57, %v2542_v32  ;;  %v2574_v16 = vand.u32 4294901760, %v1195_v23  ;;  %v1290_v60 = vand.u32 4294901760, %v2556_v49 }
  0x79   : > { %1095 = vmatpush.msrb.mxu1 %v2317_v27  ;;  %1173 = vmatpush.msrb.mxu3 %v2331_v5  ;;  %v1249_v27 = vsub.f32 %v2462_v47, %v1248_v19  ;;  %v1267_v8 = vsub.f32 %v2494_v21, %v1266_v41  ;;  %v1285_v38 = vsub.f32 %v2540_v26, %v1284_v53  ;;  %v2622_v57 = vand.u32 4294901760, %v1189_v46 }
  0x7a   : > { %1076 = vmatmul.f32.vlgmr.msrb.gmra.mxu0 %v2254_v2  ;;  %1146 = vmatpush.msrb.mxu2 %v1027_v52  ;;  %v1260_v2 = vand.u32 4294901760, %v2486_v20  ;;  %v1278_v25 = vand.u32 4294901760, %v2526_v15  ;;  %v1491_v11 = vand.u32 4294901760, %v2569_v51  ;;  %v2601_v37 = vsub.f32 %v1203_v42, %v2576_v55 }
  0x7b   : > { %1097 = vmatpush.msrb.mxu1 %v2331_v5  ;;  %1175 = vmatpush.msrb.mxu3 %v2343_v29  ;;  %v1255_v5 = vsub.f32 %v2472_v40, %v1254_v48  ;;  %v1268_v52 = vand.u32 4294901760, %v1267_v8  ;;  %v2604_v45 = vsub.f32 %v1195_v23, %v2574_v16  ;;  %v1291_v24 = vsub.f32 %v2556_v49, %v1290_v60 }
  0x7c   : > { %1150 = vmatpush.msrb.mxu2 %v1033_v13  ;;  %1214 = vmatpush.msra.mxu0 %v2448_v56  ;;  %v1261_v6 = vsub.f32 %v2486_v20, %v1260_v2  ;;  %v1279_v59 = vsub.f32 %v2526_v15, %v1278_v25  ;;  %v1492_v28 = vsub.f32 %v2569_v51, %v1491_v11  ;;  %v2628_v63 = vand.u32 4294901760, %v2601_v37 }
  0x7d   : > { %1099 = vmatpush.msrb.mxu1 %v2343_v29  ;;  %1177 = vmatpush.msrb.mxu3 %v2362_v7  ;;  %v1250_v29 = vand.u32 4294901760, %v1249_v27  ;;  %v1286_v27 = vand.u32 4294901760, %v1285_v38  ;;  %v2635_v8 = vsub.f32 %v1191_v33, %v2611_v4  ;;  %v2637_v23 = vand.u32 4294901760, %v1187_v10 }
  0x7e   : > { %1152 = vmatmul.f32.vlgmr.msrb.gmra.mxu2 %v2221_v50  ;;  %1216 = vmatpush.msra.mxu0 %v2455_v62  ;;  %v1262_v36 = vand.u32 4294901760, %v1261_v6  ;;  %v1280_v58 = vand.u32 4294901760, %v1279_v59  ;;  %v1292_v6 = vand.u32 4294901760, %v1291_v24  ;;  %v1493_v42 = vand.u32 4294901760, %v1492_v28 }
  0x7f   : > { %1309 = vmatpush.msra.mxu2 %v2462_v47  ;;  %1101 = vmatpush.msrb.mxu1 %v2362_v7  ;;  %v1256_v7 = vand.u32 4294901760, %v1255_v5  ;;  %v2620_v5 = vsub.f32 %v1193_v1, %v2593_v17  ;;  %v2657_v59 = vsub.f32 %v1187_v10, %v2637_v23 }
  0x80   : > { %1179 = vmatpush.msrb.mxu3 %v2376_v43  ;;  %1218 = vmatpush.msra.mxu0 %v2467_v22 }
  0x81   : > { %1181 = vmatmul.f32.vlgmr.msrb.gmra.mxu3 %v2221_v50  ;;  %1312 = vmatpush.msra.mxu2 %v2472_v40  ;;  %v2558_v50 = vand.u32 4294901760, %v1197_v54 }
  0x82   : > { %1346 = vmatpush.msra.mxu3 %v2448_v56  ;;  %1103 = vmatpush.msrb.mxu1 %v2376_v43  ;;  %v1273_v43 = vsub.f32 %v2511_v31, %v1272_v12 }
  0x83   : > { %1107 = vmatmul.f32.vlgmr.msrb.gmra.mxu1 %v2279_v34  ;;  %1315 = vmatpush.msra.mxu2 %v2486_v20  ;;  %v1485_v34 = vand.u32 4294901760, %v2550_v14  ;;  %v2584_v13 = vsub.f32 %v1197_v54, %v2558_v50  ;;  %v1503_v54 = vand.u32 4294901760, %v2604_v45  ;;  %v1527_v20 = vand.u32 4294901760, %v2657_v59 }
  0x84   : > { %1251 = vmatpush.msra.mxu1 %v1250_v29  ;;  %1348 = vmatpush.msra.mxu3 %v2455_v62  ;;  %v1274_v0 = vand.u32 4294901760, %v1273_v43  ;;  %v2645_v43 = vsub.f32 %v1189_v46, %v2622_v57 }
  0x85   : > { %1220 = vmatpush.msra.mxu0 %v2474_v18  ;;  %1318 = vmatpush.msra.mxu2 %v2494_v21  ;;  %v1486_v30 = vsub.f32 %v2550_v14, %v1485_v34  ;;  %v1497_v39 = vand.u32 4294901760, %v2584_v13  ;;  %v1504_v47 = vsub.f32 %v2604_v45, %v1503_v54 }
  0x86   : > { %1257 = vmatpush.msra.mxu1 %v1256_v7  ;;  %1350 = vmatpush.msra.mxu3 %v2467_v22 }
  0x87   : > { %1222 = vmatpush.msra.mxu0 %v2488_v3  ;;  %1321 = vmatpush.msra.mxu2 %v2511_v31  ;;  %v1487_v29 = vand.u32 4294901760, %v1486_v30  ;;  %v1498_v7 = vsub.f32 %v2584_v13, %v1497_v39  ;;  %v1505_v33 = vand.u32 4294901760, %v1504_v47  ;;  %v1528_v31 = vsub.f32 %v2657_v59, %v1527_v20 }
  0x88   : > { %1263 = vmatpush.msra.mxu1 %v1262_v36  ;;  %1352 = vmatpush.msra.mxu3 %v2474_v18  ;;  %v1509_v36 = vand.u32 4294901760, %v2620_v5 }
  0x89   : > { %1224 = vmatpush.msra.mxu0 %v2499_v9  ;;  %1324 = vmatpush.msra.mxu2 %v2526_v15  ;;  %v1499_v1 = vand.u32 4294901760, %v1498_v7 }
  0x8a   : > { %1269 = vmatpush.msra.mxu1 %v1268_v52  ;;  %1354 = vmatpush.msra.mxu3 %v2488_v3  ;;  %v1515_v52 = vand.u32 4294901760, %v2635_v8  ;;  %v1510_v40 = vsub.f32 %v2620_v5, %v1509_v36 }
  0x8b   : > { %1226 = vmatpush.msra.mxu0 %v2513_v35  ;;  %1327 = vmatpush.msra.mxu2 %v2540_v26 }
  0x8c   : > { %1275 = vmatpush.msra.mxu1 %v1274_v0  ;;  %1356 = vmatpush.msra.mxu3 %v2499_v9 }
  0x8d   : > { %1228 = vmatpush.msra.mxu0 %v2528_v61  ;;  %1330 = vmatpush.msra.mxu2 %v2556_v49 }
  0x8e   : > { %1281 = vmatpush.msra.mxu1 %v1280_v58  ;;  %1358 = vmatpush.msra.mxu3 %v2513_v35 }
  0x8f   : > { %1379 = vmatpush.msrb.mxu0 %v1248_v19  ;;  %1451 = vmatpush.msrb.mxu2 %v2521_v44  ;;  %v1232_v19 = vsub.f32 %v2601_v37, %v2628_v63 }
  0x90   : > { %1287 = vmatpush.msra.mxu1 %v1286_v27  ;;  %1360 = vmatpush.msra.mxu3 %v2528_v61 }
  0x91   : > { %1383 = vmatpush.msrb.mxu0 %v1254_v48  ;;  %1453 = vmatpush.msrb.mxu2 %v2542_v32  ;;  %v1521_v48 = vand.u32 4294901760, %v2645_v43  ;;  %v1233_v0 = vand.u32 4294901760, %v1232_v19 }
  0x92   : > { %1488 = vmatpush.msrb.mxu3 %v1487_v29  ;;  %1293 = vmatpush.msra.mxu1 %v1292_v6 }
  0x93   : > { %1387 = vmatpush.msrb.mxu0 %v1260_v2  ;;  %1455 = vmatpush.msrb.mxu2 %v2558_v50  ;;  %v1522_v21 = vsub.f32 %v2645_v43, %v1521_v48 }
  0x94   : > { %1422 = vmatpush.msrb.mxu1 %v2448_v56  ;;  %1494 = vmatpush.msrb.mxu3 %v1493_v42  ;;  %v1516_v56 = vsub.f32 %v2635_v8, %v1515_v52 }
  0x95   : > { %1391 = vmatpush.msrb.mxu0 %v1266_v41  ;;  %1457 = vmatpush.msrb.mxu2 %v2574_v16  ;;  %v1529_v41 = vand.u32 4294901760, %v1528_v31 }
  0x96   : > { %1424 = vmatpush.msrb.mxu1 %v2455_v62  ;;  %1500 = vmatpush.msrb.mxu3 %v1499_v1  ;;  %v1511_v62 = vand.u32 4294901760, %v1510_v40  ;;  %v1517_v2 = vand.u32 4294901760, %v1516_v56 }
  0x97   : > { %1333 = vmatmul.f32.vlgmr.msra.gmra.mxu2 %v2601_v37  ;;  %1395 = vmatpush.msrb.mxu0 %v1272_v12 }
  0x98   : > { %1426 = vmatpush.msrb.mxu1 %v2467_v22  ;;  %1459 = vmatpush.msrb.mxu2 %v2593_v17  ;;  %v1523_v22 = vand.u32 4294901760, %v1522_v21 }
  0x99   : > { %1506 = vmatpush.msrb.mxu3 %v1505_v33  ;;  %1234 = vmatmul.f32.vlgmr.msra.gmra.mxu0 %v1233_v0 }
  0x9a   : > { %1364 = vmatmul.f32.vlgmr.msra.gmra.mxu3 %v2628_v63  ;;  %1399 = vmatpush.msrb.mxu0 %v1278_v25 }
  0x9b   : > { %1428 = vmatpush.msrb.mxu1 %v2474_v18  ;;  %1461 = vmatpush.msrb.mxu2 %v2611_v4 }
  0x9c   : > { %1512 = vmatpush.msrb.mxu3 %v1511_v62  ;;  %1295 = vmatmul.f32.vlgmr.msra.gmra.mxu1 %v2576_v55 }
  0x9d   : > { %1403 = vmatpush.msrb.mxu0 %v1284_v53  ;;  %1430 = vmatpush.msrb.mxu1 %v2488_v3 }
  0x9e   : > { %1463 = vmatpush.msrb.mxu2 %v2622_v57  ;;  %1518 = vmatpush.msrb.mxu3 %v1517_v2 }
  0x9f   : > { %1407 = vmatpush.msrb.mxu0 %v1290_v60  ;;  %1432 = vmatpush.msrb.mxu1 %v2499_v9 }
  0xa0   : > { %1465 = vmatpush.msrb.mxu2 %v2637_v23  ;;  %1524 = vmatpush.msrb.mxu3 %v1523_v22 }
  0xa1   : > { %1546 = vmatpush.msra.mxu0 %v2550_v14  ;;  %1434 = vmatpush.msrb.mxu1 %v2513_v35 }
  0xa2   : > { %1616 = vmatpush.msra.mxu2 %v1485_v34  ;;  %1530 = vmatpush.msrb.mxu3 %v1529_v41 }
  0xa3   : > { %1409 = vmatmul.f32.vlgmr.msrb.gmra.mxu0 %v2576_v55  ;;  %1436 = vmatpush.msrb.mxu1 %v2528_v61 }
  0xa4   : > { %1620 = vmatpush.msra.mxu2 %v1491_v11  ;;  %1549 = vmatpush.msra.mxu0 %v2569_v51 }
  0xa5   : > { %1659 = vmatpush.msra.mxu3 %v2521_v44  ;;  %1438 = vmatmul.f32.vlgmr.msrb.gmra.mxu1 %v2576_v55 }
  0xa6   : > { %1624 = vmatpush.msra.mxu2 %v1497_v39  ;;  %1552 = vmatpush.msra.mxu0 %v2584_v13 }
  0xa7   : > { %1583 = vmatpush.msra.mxu1 %v2521_v44  ;;  %1661 = vmatpush.msra.mxu3 %v2542_v32 }
  0xa8   : > { %1555 = vmatpush.msra.mxu0 %v2604_v45  ;;  %1628 = vmatpush.msra.mxu2 %v1503_v54 }
  0xa9   : > { %1585 = vmatpush.msra.mxu1 %v2542_v32  ;;  %1663 = vmatpush.msra.mxu3 %v2558_v50 }
  0xaa   : > { %1471 = vmatmul.f32.vlgmr.msrb.gmra.mxu2 %v1233_v0  ;;  %1532 = vmatmul.f32.vlgmr.msrb.gmra.mxu3 %v2576_v55 }
  0xab   : > { %1558 = vmatpush.msra.mxu0 %v2620_v5  ;;  %1587 = vmatpush.msra.mxu1 %v2558_v50 }
  0xac   : > { %1632 = vmatpush.msra.mxu2 %v1509_v36  ;;  %1665 = vmatpush.msra.mxu3 %v2574_v16  ;;  %v264_v18 = vpop.f32.mrf.mxu0 }
  0xad   : > { %1561 = vmatpush.msra.mxu0 %v2635_v8  ;;  %1589 = vmatpush.msra.mxu1 %v2574_v16 }
  0xae   : > { %1636 = vmatpush.msra.mxu2 %v1515_v52  ;;  %1667 = vmatpush.msra.mxu3 %v2593_v17 }
  0xaf   : > { %1564 = vmatpush.msra.mxu0 %v2645_v43  ;;  %1591 = vmatpush.msra.mxu1 %v2593_v17 }
  0xb0   : > { %1640 = vmatpush.msra.mxu2 %v1521_v48  ;;  %1669 = vmatpush.msra.mxu3 %v2611_v4 }
  0xb1   : > { %1567 = vmatpush.msra.mxu0 %v2657_v59  ;;  %1593 = vmatpush.msra.mxu1 %v2611_v4 }
  0xb2   : > { %1644 = vmatpush.msra.mxu2 %v1527_v20  ;;  %1671 = vmatpush.msra.mxu3 %v2622_v57 }
  0xb3   : > { %1570 = vmatmul.f32.vlgmr.msra.gmra.mxu0 %v2601_v37  ;;  %1646 = vmatmul.f32.vlgmr.msra.gmra.mxu2 %v2576_v55 }
  0xb4   : > { %1595 = vmatpush.msra.mxu1 %v2622_v57  ;;  %1673 = vmatpush.msra.mxu3 %v2637_v23 }
  0xb5   : > { %1675 = vmatmul.f32.vlgmr.msra.gmra.mxu3 %v2576_v55 }
  0xb6   : > { %1597 = vmatpush.msra.mxu1 %v2637_v23  ;;  %v325_v3 = vpop.f32.mrf.mxu1 }
  0xb7   : > { %1601 = vmatmul.f32.vlgmr.msra.gmra.mxu1 %v2628_v63  ;;  %v363_v9 = vpop.f32.mrf.mxu2  ;;  %v326_v11 = vadd.f32 %v325_v3, %v264_v18 }
  0xb9   : > { %v394_v35 = vpop.f32.mrf.mxu3  ;;  %v364_v37 = vadd.f32 %v363_v9, %v326_v11 }
  0xbb   : > { %v395_v39 = vadd.f32 %v394_v35, %v364_v37 }
  0xbc   : > { %v439_v44 = vpop.f32.mrf.mxu0 }
  0xbd   : > { %v440_v27 = vadd.f32 %v439_v44, %v395_v39 }
  0xbe   : > { %v468_v15 = vpop.f32.mrf.mxu1 }
  0xbf   : > { %v469_v54 = vadd.f32 %v468_v15, %v440_v27 }
  0xc9   : > { %v501_v61 = vpop.f32.mrf.mxu2  ;;  %v600_v26 = vpop.f32.mrf.mxu0 }
  0xcc   : > { %v562_v12 = vpop.f32.mrf.mxu3 }
  0xcd   : > { %v563_v38 = vadd.f32 %v562_v12, %v501_v61 }
  0xcf   : > { %v601_v30 = vadd.f32 %v600_v26, %v563_v38 }
  0xd1   : > { %v631_v32 = vpop.f32.mrf.mxu1 }
  0xd2   : > { %v676_v14 = vpop.f32.mrf.mxu2  ;;  %v632_v24 = vadd.f32 %v631_v32, %v601_v30 }
  0xd4   : > { %v741_v49 = vpop.f32.mrf.mxu0  ;;  %v677_v10 = vadd.f32 %v676_v14, %v632_v24 }
  0xd5   : > { %v705_v25 = vpop.f32.mrf.mxu3  ;;  %v742_v7 = vadd.f32 %v741_v49, %v469_v54 }
  0xd6   : > { %v706_v57 = vadd.f32 %v705_v25, %v677_v10 }
  0xde   : > { %v802_v50 = vpop.f32.mrf.mxu1  ;;  %v840_v53 = vpop.f32.mrf.mxu2 }
  0xdf   : > { %v803_v23 = vadd.f32 %v802_v50, %v742_v7 }
  0xe1   : > { %v871_v51 = vpop.f32.mrf.mxu3  ;;  %v841_v59 = vadd.f32 %v840_v53, %v803_v23 }
  0xe3   : > { %v872_v56 = vadd.f32 %v871_v51, %v841_v59 }
  0xe6   : > { %v916_v34 = vpop.f32.mrf.mxu0 }
  0xe7   : > { %v917_v41 = vadd.f32 %v916_v34, %v872_v56 }
  0xee   : > { %v978_v55 = vpop.f32.mrf.mxu2 }
  0xef   : > { %v945_v16 = vpop.f32.mrf.mxu1  ;;  %v979_v63 = vadd.f32 %v978_v55, %v706_v57 }
  0xf0   : > { %v946_v35 = vadd.f32 %v945_v16, %v917_v41 }
  0xf1   : > { %v1039_v60 = vpop.f32.mrf.mxu3 }
  0xf2   : > { %v1040_v42 = vadd.f32 %v1039_v60, %v979_v63 }
  0xf7   : > { %v1077_v13 = vpop.f32.mrf.mxu0 }
  0xf8   : > { %v1078_v19 = vadd.f32 %v1077_v13, %v1040_v42 }
 0x100   : > { %v1108_v17 = vpop.f32.mrf.mxu1 }
 0x101   : > { %v1153_v45 = vpop.f32.mrf.mxu2  ;;  %v1109_v40 = vadd.f32 %v1108_v17, %v1078_v19 }
 0x103   : > { %v1154_v20 = vadd.f32 %v1153_v45, %v1109_v40 }
 0x104   : > { %v1182_v46 = vpop.f32.mrf.mxu3 }
 0x105   : > { %v1183_v18 = vadd.f32 %v1182_v46, %v1154_v20 }
 0x116   : > { %v1235_v58 = vpop.f32.mrf.mxu0 }
 0x119   : > { %v1296_v4 = vpop.f32.mrf.mxu1 }
 0x11a   : > { %v1334_v28 = vpop.f32.mrf.mxu2  ;;  %v1297_v6 = vadd.f32 %v1296_v4, %v1235_v58 }
 0x11c   : > { %v1335_v36 = vadd.f32 %v1334_v28, %v1297_v6 }
 0x11d   : > { %v1365_v5 = vpop.f32.mrf.mxu3 }
 0x11e   : > { %v1366_v48 = vadd.f32 %v1365_v5, %v1335_v36 }
 0x120   : > { %v1410_v29 = vpop.f32.mrf.mxu0 }
 0x121   : > { %v1411_v62 = vadd.f32 %v1410_v29, %v1366_v48 }
 0x122   : > { %v1439_v8 = vpop.f32.mrf.mxu1 }
 0x123   : > { %v1440_v3 = vadd.f32 %v1439_v8, %v1411_v62 }
 0x125   : > { %v1679_v15 = vadd.f32 %v1440_v3, %v946_v35 }
 0x12d   : > { %v1472_v43 = vpop.f32.mrf.mxu2  ;;  %v1533_v47 = vpop.f32.mrf.mxu3 }
 0x12e   : > { %v1534_v1 = vadd.f32 %v1533_v47, %v1472_v43 }
 0x130   : > { %v1571_v52 = vpop.f32.mrf.mxu0 }
 0x131   : > { %v1572_v33 = vadd.f32 %v1571_v52, %v1534_v1 }
 0x134   : > { %v1602_v0 = vpop.f32.mrf.mxu1 }
 0x135   : > { %v1603_v21 = vadd.f32 %v1602_v0, %v1572_v33 }
 0x136   : > { %v1647_v2 = vpop.f32.mrf.mxu2 }
 0x137   : > { %v1648_v31 = vadd.f32 %v1647_v2, %v1603_v21 }
 0x138   : > { %v1676_v22 = vpop.f32.mrf.mxu3 }
 0x139   : > { %v1677_v9 = vadd.f32 %v1676_v22, %v1648_v31 }
 0x13b   : > { %v1680_v44 = vadd.f32 %v1677_v9, %v1183_v18 }
 0x13d   : > { %v1683_v61 = vrot.slane %v1680_v44, 4 }
 0x13f   : > { %v1685_v12 = vsel %vm1684_vm1, %v1679_v15, %v1683_v61 }
 0x140   : > { %1689 = vst.msk [vmem:[%s193_s28] sm:$0xff] %vm1688_vm3, %v1685_v12 }
 0x141 PF: > { %s13_s11 = sadd.s32 1, %s1899_s11   ;;  %s2761_s9 = smov %s1895_s10 }
 0x142   : > { %p10_p8 = scmp.ge.s32.totalorder %s13_s11, 4   ;;  %s2762_s10 = smov %s2764_s13 }
 0x144   :  { %12 = sbr.rel (!%p10_p8) target bundleno = 2 (0x2), region = 65 }
 0x149   :  { %1719 = vsyncpa [#allocation3], 1 }
 0x14a   :  { %1721 = vsyncpa [#allocation3 + $0x1], 1 }

</bundles_post_ra>
